<compile_context>
chip_gen: v6e
topology: v6e:2x2x1
jax: 0.10.0
libtpu: 0.0.40
codegen_flags: <defaults>
</compile_context>

<pallas_src>
import jax
import jax.numpy as jnp
import numpy as np
from jax.experimental import pallas as pl
from jax.experimental.pallas import tpu as pltpu

BN_EPS = 1e-5


# ---------------------------------------------------------------------------
# Kernel
# ---------------------------------------------------------------------------
def unet_down_kernel(x_ref, wb1_ref, wb2_ref, s_ref, par_ref, o_ref):
    """Fused MaxPool2d(2) -> [conv3x3 + bias -> ReLU -> BN(eval)] x 2.

    Per grid step (B images stacked along sublanes, BH = B*H2 rows):
      x_ref   : (4*BH, W2*Cin)     tap-major pooling rows (tap*BH + img*H2 + y)
      wb1_ref : (3, W2*Cin, W2*Cp) banded conv1 weights (kx/ci/'same' pad folded)
      wb2_ref : (3, W2*Cp,  W2*Cp) banded conv2 weights
      s_ref   : (2, BH, BH)        0/1 row-shift matrices (per-image vertical pad)
      par_ref : (8, W2*Cp)         rows 0..5 = b1, s1, t1, b2, s2, t2
      o_ref   : (BH, W2*Cp)        lane-dense output slab
    """
    bh = o_ref.shape[0]
    cdt = wb1_ref.dtype                      # compute dtype for MXU operands

    # ---- MaxPool2d(2): four contiguous, 8-aligned tap blocks -> elementwise max.
    pooled = jnp.maximum(
        jnp.maximum(x_ref[0 * bh:1 * bh, :], x_ref[1 * bh:2 * bh, :]),
        jnp.maximum(x_ref[2 * bh:3 * bh, :], x_ref[3 * bh:4 * bh, :]),
    )                                        # (BH, W2*Cin) float32

    s_up = s_ref[0]   # row y selects row y-1 (zero row at each image's top)
    s_dn = s_ref[1]   # row y selects row y+1 (zero row at each image's bottom)

    def conv_bias_relu_bn(act, wb_ref, p0):
        # act: (BH, L) f32 in vregs.  Vertical ky taps come from exact 0/1
        # row-selection matmuls (S @ act, MXU); kx / input channels / the
        # horizontal 'same' padding live in the banded weights, so each tap is
        # one plain matmul — no scratch stores, no sublane-unaligned loads.
        a = act.astype(cdt)
        a_up = jnp.dot(s_up, a, preferred_element_type=jnp.float32).astype(cdt)
        a_dn = jnp.dot(s_dn, a, preferred_element_type=jnp.float32).astype(cdt)
        acc = jnp.dot(a, wb_ref[1], preferred_element_type=jnp.float32)
        acc += jnp.dot(a_up, wb_ref[0], preferred_element_type=jnp.float32)
        acc += jnp.dot(a_dn, wb_ref[2], preferred_element_type=jnp.float32)
        h = jnp.maximum(acc + par_ref[p0:p0 + 1, :], 0.0)                 # bias+ReLU
        return h * par_ref[p0 + 1:p0 + 2, :] + par_ref[p0 + 2:p0 + 3, :]  # BN eval

    h1 = conv_bias_relu_bn(pooled, wb1_ref, 0)
    out = conv_bias_relu_bn(h1, wb2_ref, 3)
    o_ref[...] = out.astype(o_ref.dtype)
    # TODO(synk): nn.Dropout2d (dropout=True) would need pltpu.prng_* channel
    # masks; this config uses dropout=False (and eval-mode Dropout2d is identity).


# ---------------------------------------------------------------------------
# Parameter packing
# ---------------------------------------------------------------------------
def _expand_band_weights(w_hwio, w2, in_stride, out_stride):
    """Fold kx taps, input channels and horizontal 'same' padding of a KxK conv
    into K banded matrices: out[y, x*out_stride+co] = sum_ky act[y+ky-1] @ band[ky]."""
    kh, kw, cin, cout = w_hwio.shape
    w_np = np.asarray(w_hwio, dtype=np.float32)
    band = np.zeros((kh, w2 * in_stride, w2 * out_stride), np.float32)
    for ky in range(kh):
        for kx in range(kw):
            for x in range(w2):
                xin = x + kx - (kw // 2)
                if 0 <= xin < w2:
                    band[ky,
                         xin * in_stride:xin * in_stride + cin,
                         x * out_stride:x * out_stride + cout] = w_np[ky, kx]
    return band


def _tile_channel_vec(v, cout_pad, w2):
    """(Cout,) -> (w2*cout_pad,) so lane x*cout_pad + co holds v[co] (0 in pad)."""
    vp = np.zeros((cout_pad,), np.float32)
    vp[:v.shape[0]] = np.asarray(v, np.float32)
    return np.tile(vp, w2)


def pack_params(torch_params, in_ch, out_ch, W, compute_dtype=jnp.bfloat16):
    """PyTorch-shaped (OIHW conv, BN stats) params -> kernel operands."""
    (w1_oihw, b1, g1, be1, m1, v1, w2_oihw, b2, g2, be2, m2, v2) = torch_params
    W2 = W // 2
    cout_pad = max(out_ch, -(-128 // W2))        # lane-dense: W2*cout_pad % 128 == 0
    while (W2 * cout_pad) % 128 != 0:
        cout_pad += 1

    def hwio(w):                                 # OIHW -> (kh, kw, cin, cout)
        return jnp.transpose(w, (2, 3, 1, 0))

    # bf16 band weights by default: native MXU path, half the resident bytes.
    wb1 = jnp.asarray(_expand_band_weights(hwio(w1_oihw), W2, in_ch, cout_pad),
                      dtype=compute_dtype)
    wb2 = jnp.asarray(_expand_band_weights(hwio(w2_oihw), W2, cout_pad, cout_pad),
                      dtype=compute_dtype)

    def fold_bn(g, be, m, v):                    # eval-mode BN -> per-channel affine
        s = np.asarray(g) / np.sqrt(np.asarray(v) + BN_EPS)
        return s, np.asarray(be) - np.asarray(m) * s

    s1, t1 = fold_bn(g1, be1, m1, v1)
    s2, t2 = fold_bn(g2, be2, m2, v2)

    par = np.zeros((8, W2 * cout_pad), np.float32)   # single (8,128) tile, one DMA
    for i, vec in enumerate((b1, s1, t1, b2, s2, t2)):
        par[i] = _tile_channel_vec(vec, cout_pad, W2)
    return wb1, wb2, jnp.asarray(par)                # par stays f32 (f32 epilogue)


# ---------------------------------------------------------------------------
# Wrapper
# ---------------------------------------------------------------------------
def unet_down_forward(x_nchw, wb1, wb2, par, out_ch, *, images_per_step=8):
    """x_nchw: (N, Cin, H, W) float32 -> (N, out_ch, H//2, W//2)."""
    N, Cin, H, W = x_nchw.shape
    assert H % 2 == 0 and W % 2 == 0
    H2, W2 = H // 2, W // 2
    K, L1, L2 = wb1.shape
    cout_pad = L2 // W2
    assert L1 == W2 * Cin and wb2.shape == (K, L2, L2) and par.shape == (8, L2)

    # Images per grid step: fatten the matmuls (M = B*H2 sublanes instead of H2)
    # while keeping grid length >= 2 so both v7x TensorCores stay busy.
    B = int(max(1, min(images_per_step, pl.cdiv(N, 2))))
    G = pl.cdiv(N, B)
    n_pad = G * B
    if n_pad != N:
        x_nchw = jnp.pad(x_nchw, ((0, n_pad - N), (0, 0), (0, 0), (0, 0)))
    BH = B * H2

    # Single layout pass NCHW -> tap-major rows: row = tap*BH + img*H2 + y,
    # lane = x*Cin + c, so the four MaxPool taps are contiguous 8-aligned row
    # blocks (no stride-4 sublane gathers in-kernel).
    # TODO(synk): at larger shapes keep the surrounding model channels-last /
    # slab layout so this HBM round trip (and the NCHW restore below) disappears.
    x_rows = (x_nchw.reshape(G, B, Cin, H2, 2, W2, 2)
              .transpose(0, 4, 6, 1, 3, 5, 2)
              .reshape(G * 4 * BH, W2 * Cin))

    # Per-image vertical 'same' padding as 0/1 row-shift matrices (exact row
    # selection, zero rows at each image's top/bottom).  Applied on the MXU in
    # the kernel so pooled/h1 never leave vregs.
    y = np.arange(BH)
    s_up = (y[:, None] - 1 == y[None, :]) & (y[:, None] % H2 != 0)
    s_dn = (y[:, None] + 1 == y[None, :]) & (y[:, None] % H2 != H2 - 1)
    s_mats = jnp.asarray(np.stack([s_up, s_dn]).astype(np.float32), dtype=wb1.dtype)

    grid_spec = pltpu.PrefetchScalarGridSpec(
        num_scalar_prefetch=0,
        grid=(G,),                            # B images per step, >= 2 steps
        in_specs=[
            pl.BlockSpec((4 * BH, L1), lambda n: (n, 0)),
            # Constant index maps: weights / shift matrices / fused params stay
            # resident across the grid (one DMA each).  At real UNet channel
            # counts on v7x (64 MiB VMEM) add pipeline_mode=pl.Buffered(1) on
            # these constant operands plus an explicit vmem_limit_bytes to halve
            # their residency; at this footprint (<0.5 MiB) it is unnecessary.
            pl.BlockSpec((K, L1, L2), lambda n: (0, 0, 0)),
            pl.BlockSpec((K, L2, L2), lambda n: (0, 0, 0)),
            pl.BlockSpec((2, BH, BH), lambda n: (0, 0, 0)),
            pl.BlockSpec((8, L2), lambda n: (0, 0)),
        ],
        out_specs=pl.BlockSpec((BH, L2), lambda n: (n, 0)),
    )
    # NOTE(scaling): the banded-weight formulation is O((W2*C)^2) bytes and does
    # ~W2/3 redundant FLOPs on structural zeros; it is only appropriate while
    # W2*Cout stays near 128..512 lanes (as here).  For realistic UNet strips
    # (W2 >= 32, C >= 64) switch to per-kx matmuls with lane rolls / im2col and
    # row-strip tiling over H2 with a 1-row halo.

    out_rows = pl.pallas_call(
        unet_down_kernel,
        out_shape=jax.ShapeDtypeStruct((G * BH, L2), jnp.float32),
        grid_spec=grid_spec,
        compiler_params=pltpu.CompilerParams(
            dimension_semantics=("parallel",)),    # v7x: one step per TensorCore
    )(x_rows, wb1, wb2, s_mats, par)

    out = out_rows.reshape(n_pad, H2, W2, cout_pad)[:N, :, :, :out_ch]
    return jnp.transpose(out, (0, 3, 1, 2))        # back to NCHW


# ---------------------------------------------------------------------------
# Pure-JAX reference mirroring the PyTorch module (eval mode)
# ---------------------------------------------------------------------------
def reference_forward(x_nchw, torch_params):
    (w1_oihw, b1, g1, be1, m1, v1, w2_oihw, b2, g2, be2, m2, v2) = torch_params
    N, C, H, W = x_nchw.shape
    x = x_nchw.reshape(N, C, H // 2, 2, W // 2, 2).max(axis=(3, 5))   # MaxPool2d(2)
    for (w, b, g, be, m, v) in ((w1_oihw, b1, g1, be1, m1, v1),
                                (w2_oihw, b2, g2, be2, m2, v2)):
        y = jax.lax.conv_general_dilated(
            x, w, window_strides=(1, 1), padding="SAME",
            dimension_numbers=("NCHW", "OIHW", "NCHW"))
        y = y + b[None, :, None, None]
        y = jnp.maximum(y, 0.0)                                        # ReLU
        y = (y - m[None, :, None, None]) / jnp.sqrt(v[None, :, None, None] + BN_EPS)
        y = y * g[None, :, None, None] + be[None, :, None, None]       # BN2d eval
        x = y
    return x


if __name__ == "__main__":
    # Module config: in_ch=4, out_ch=8, num_rep=2, batch_norm=True,
    # activation=ReLU, kernel_size=3, dropout=False, maxpool=True.
    # Batch 16 so the kernel demonstrates 8 images per grid step (M=64-row
    # matmuls) across a 2-step "parallel" grid.
    N, IN_CH, OUT_CH, H, W, K = 16, 4, 8, 16, 16, 3

    key = jax.random.PRNGKey(0)
    ks = jax.random.split(key, 16)

    w1_oihw = 0.1 * jax.random.normal(ks[0], (OUT_CH, IN_CH, K, K), jnp.float32)
    b1 = 0.05 * jax.random.normal(ks[1], (OUT_CH,), jnp.float32)
    g1 = 1.0 + 0.1 * jax.random.normal(ks[2], (OUT_CH,), jnp.float32)
    be1 = 0.1 * jax.random.normal(ks[3], (OUT_CH,), jnp.float32)
    m1 = 0.05 * jax.random.normal(ks[4], (OUT_CH,), jnp.float32)
    v1 = jax.random.uniform(ks[5], (OUT_CH,), jnp.float32, 0.5, 1.5)

    w2_oihw = 0.1 * jax.random.normal(ks[6], (OUT_CH, OUT_CH, K, K), jnp.float32)
    b2 = 0.05 * jax.random.normal(ks[7], (OUT_CH,), jnp.float32)
    g2 = 1.0 + 0.1 * jax.random.normal(ks[8], (OUT_CH,), jnp.float32)
    be2 = 0.1 * jax.random.normal(ks[9], (OUT_CH,), jnp.float32)
    m2 = 0.05 * jax.random.normal(ks[10], (OUT_CH,), jnp.float32)
    v2 = jax.random.uniform(ks[11], (OUT_CH,), jnp.float32, 0.5, 1.5)

    x = jax.random.normal(ks[12], (N, IN_CH, H, W), jnp.float32)

    torch_params = (w1_oihw, b1, g1, be1, m1, v1,
                    w2_oihw, b2, g2, be2, m2, v2)

    ref = jax.block_until_ready(reference_forward(x, torch_params))

    # Strict validation: float32 weights (mathematically identical algorithm).
    wb1_f32, wb2_f32, par_f32 = pack_params(torch_params, IN_CH, OUT_CH, W,
                                            compute_dtype=jnp.float32)
    out_f32 = jax.block_until_ready(
        unet_down_forward(x, wb1_f32, wb2_f32, par_f32, OUT_CH, images_per_step=8))
    assert out_f32.shape == (N, OUT_CH, H // 2, W // 2), out_f32.shape
    err_f32 = float(jnp.max(jnp.abs(out_f32 - ref)))
    assert jnp.allclose(out_f32, ref, atol=1e-3, rtol=1e-3), err_f32

    # Performance dtype: bfloat16 band weights / shift matrices on the MXU with
    # f32 accumulation.  The looser tolerance only reflects bf16 operand
    # quantization; algorithmic correctness is pinned by the f32 check above.
    wb1, wb2, par = pack_params(torch_params, IN_CH, OUT_CH, W,
                                compute_dtype=jnp.bfloat16)
    out_bf16 = jax.block_until_ready(
        unet_down_forward(x, wb1, wb2, par, OUT_CH, images_per_step=8))
    assert out_bf16.shape == (N, OUT_CH, H // 2, W // 2), out_bf16.shape
    err_bf16 = float(jnp.max(jnp.abs(out_bf16 - ref)))
    assert jnp.allclose(out_bf16, ref, atol=1e-1, rtol=5e-2), err_bf16

    print("KERNEL_OK")
</pallas_src>

<mosaic_0001>
module attributes {stable_mosaic.version = 11 : i64} {
  func.func @unet_down_kernel(%arg0: i32, %arg1: memref<256x32xf32, #tpu.memory_space<vmem>>, %arg2: memref<3x32x128xf32, #tpu.memory_space<vmem>>, %arg3: memref<3x128x128xf32, #tpu.memory_space<vmem>>, %arg4: memref<2x64x64xf32, #tpu.memory_space<vmem>>, %arg5: memref<8x128xf32, #tpu.memory_space<vmem>>, %arg6: memref<64x128xf32, #tpu.memory_space<vmem>>) attributes {dimension_semantics = [#tpu.dimension_semantics<parallel>], iteration_bounds = array<i64: 2>, scalar_prefetch = 0 : i64, scratch_operands = 0 : i64, tpu.core_type = #tpu.core_type<tc>, window_params = [{transform_indices = @transform_0, window_bounds = array<i64: 256, 32>}, {pipeline_mode = #tpu.pipeline_mode<synchronous>, transform_indices = @transform_1, window_bounds = array<i64: 3, 32, 128>}, {pipeline_mode = #tpu.pipeline_mode<synchronous>, transform_indices = @transform_2, window_bounds = array<i64: 3, 128, 128>}, {pipeline_mode = #tpu.pipeline_mode<synchronous>, transform_indices = @transform_3, window_bounds = array<i64: 2, 64, 64>}, {pipeline_mode = #tpu.pipeline_mode<synchronous>, transform_indices = @transform_4, window_bounds = array<i64: 8, 128>}, {transform_indices = @transform_5, window_bounds = array<i64: 64, 128>}]} {
    %c0 = arith.constant 0 : index
    %c0_0 = arith.constant 0 : index
    %0 = vector.load %arg1[%c0, %c0_0] : memref<256x32xf32, #tpu.memory_space<vmem>>, vector<64x32xf32>
    %c64 = arith.constant 64 : index
    %c0_1 = arith.constant 0 : index
    %1 = vector.load %arg1[%c64, %c0_1] : memref<256x32xf32, #tpu.memory_space<vmem>>, vector<64x32xf32>
    %2 = arith.maximumf %0, %1 : vector<64x32xf32>
    %c128 = arith.constant 128 : index
    %c0_2 = arith.constant 0 : index
    %3 = vector.load %arg1[%c128, %c0_2] : memref<256x32xf32, #tpu.memory_space<vmem>>, vector<64x32xf32>
    %c192 = arith.constant 192 : index
    %c0_3 = arith.constant 0 : index
    %4 = vector.load %arg1[%c192, %c0_3] : memref<256x32xf32, #tpu.memory_space<vmem>>, vector<64x32xf32>
    %5 = arith.maximumf %3, %4 : vector<64x32xf32>
    %6 = arith.maximumf %2, %5 : vector<64x32xf32>
    %c0_4 = arith.constant 0 : index
    %c0_5 = arith.constant 0 : index
    %c0_6 = arith.constant 0 : index
    %7 = vector.load %arg4[%c0_4, %c0_5, %c0_6] : memref<2x64x64xf32, #tpu.memory_space<vmem>>, vector<1x64x64xf32>
    %8 = vector.shape_cast %7 : vector<1x64x64xf32> to vector<64x64xf32>
    %c1 = arith.constant 1 : index
    %c0_7 = arith.constant 0 : index
    %c0_8 = arith.constant 0 : index
    %9 = vector.load %arg4[%c1, %c0_7, %c0_8] : memref<2x64x64xf32, #tpu.memory_space<vmem>>, vector<1x64x64xf32>
    %10 = vector.shape_cast %9 : vector<1x64x64xf32> to vector<64x64xf32>
    %cst = arith.constant dense<0.000000e+00> : vector<64x32xf32>
    %11 = tpu.matmul %8, %6, %cst {dimension_numbers = #tpu.dot_dimension_numbers<[1], [0], [0], [1], [0, 0, 1, 1], [], []>} : vector<64x64xf32>, vector<64x32xf32>, vector<64x32xf32> -> vector<64x32xf32>
    %cst_9 = arith.constant dense<0.000000e+00> : vector<64x32xf32>
    %12 = tpu.matmul %10, %6, %cst_9 {dimension_numbers = #tpu.dot_dimension_numbers<[1], [0], [0], [1], [0, 0, 1, 1], [], []>} : vector<64x64xf32>, vector<64x32xf32>, vector<64x32xf32> -> vector<64x32xf32>
    %c1_10 = arith.constant 1 : index
    %c0_11 = arith.constant 0 : index
    %c0_12 = arith.constant 0 : index
    %13 = vector.load %arg2[%c1_10, %c0_11, %c0_12] : memref<3x32x128xf32, #tpu.memory_space<vmem>>, vector<1x32x128xf32>
    %14 = vector.shape_cast %13 : vector<1x32x128xf32> to vector<32x128xf32>
    %cst_13 = arith.constant dense<0.000000e+00> : vector<64x128xf32>
    %15 = tpu.matmul %6, %14, %cst_13 {dimension_numbers = #tpu.dot_dimension_numbers<[1], [0], [0], [1], [0, 0, 1, 1], [], []>} : vector<64x32xf32>, vector<32x128xf32>, vector<64x128xf32> -> vector<64x128xf32>
    %c0_14 = arith.constant 0 : index
    %c0_15 = arith.constant 0 : index
    %c0_16 = arith.constant 0 : index
    %16 = vector.load %arg2[%c0_14, %c0_15, %c0_16] : memref<3x32x128xf32, #tpu.memory_space<vmem>>, vector<1x32x128xf32>
    %17 = vector.shape_cast %16 : vector<1x32x128xf32> to vector<32x128xf32>
    %cst_17 = arith.constant dense<0.000000e+00> : vector<64x128xf32>
    %18 = tpu.matmul %11, %17, %cst_17 {dimension_numbers = #tpu.dot_dimension_numbers<[1], [0], [0], [1], [0, 0, 1, 1], [], []>} : vector<64x32xf32>, vector<32x128xf32>, vector<64x128xf32> -> vector<64x128xf32>
    %19 = arith.addf %15, %18 : vector<64x128xf32>
    %c2 = arith.constant 2 : index
    %c0_18 = arith.constant 0 : index
    %c0_19 = arith.constant 0 : index
    %20 = vector.load %arg2[%c2, %c0_18, %c0_19] : memref<3x32x128xf32, #tpu.memory_space<vmem>>, vector<1x32x128xf32>
    %21 = vector.shape_cast %20 : vector<1x32x128xf32> to vector<32x128xf32>
    %cst_20 = arith.constant dense<0.000000e+00> : vector<64x128xf32>
    %22 = tpu.matmul %12, %21, %cst_20 {dimension_numbers = #tpu.dot_dimension_numbers<[1], [0], [0], [1], [0, 0, 1, 1], [], []>} : vector<64x32xf32>, vector<32x128xf32>, vector<64x128xf32> -> vector<64x128xf32>
    %23 = arith.addf %19, %22 : vector<64x128xf32>
    %c0_21 = arith.constant 0 : index
    %c0_22 = arith.constant 0 : index
    %24 = vector.load %arg5[%c0_21, %c0_22] : memref<8x128xf32, #tpu.memory_space<vmem>>, vector<1x128xf32>
    %25 = vector.broadcast %24 : vector<1x128xf32> to vector<64x128xf32>
    %26 = arith.addf %23, %25 : vector<64x128xf32>
    %cst_23 = arith.constant 0.000000e+00 : f32
    %27 = vector.broadcast %cst_23 : f32 to vector<64x128xf32>
    %28 = arith.maximumf %26, %27 : vector<64x128xf32>
    %c1_24 = arith.constant 1 : index
    %c0_25 = arith.constant 0 : index
    %29 = vector.load %arg5[%c1_24, %c0_25] : memref<8x128xf32, #tpu.memory_space<vmem>>, vector<1x128xf32>
    %30 = vector.broadcast %29 : vector<1x128xf32> to vector<64x128xf32>
    %31 = arith.mulf %28, %30 : vector<64x128xf32>
    %c2_26 = arith.constant 2 : index
    %c0_27 = arith.constant 0 : index
    %32 = vector.load %arg5[%c2_26, %c0_27] : memref<8x128xf32, #tpu.memory_space<vmem>>, vector<1x128xf32>
    %33 = vector.broadcast %32 : vector<1x128xf32> to vector<64x128xf32>
    %34 = arith.addf %31, %33 : vector<64x128xf32>
    %cst_28 = arith.constant dense<0.000000e+00> : vector<64x128xf32>
    %35 = tpu.matmul %8, %34, %cst_28 {dimension_numbers = #tpu.dot_dimension_numbers<[1], [0], [0], [1], [0, 0, 1, 1], [], []>} : vector<64x64xf32>, vector<64x128xf32>, vector<64x128xf32> -> vector<64x128xf32>
    %cst_29 = arith.constant dense<0.000000e+00> : vector<64x128xf32>
    %36 = tpu.matmul %10, %34, %cst_29 {dimension_numbers = #tpu.dot_dimension_numbers<[1], [0], [0], [1], [0, 0, 1, 1], [], []>} : vector<64x64xf32>, vector<64x128xf32>, vector<64x128xf32> -> vector<64x128xf32>
    %c1_30 = arith.constant 1 : index
    %c0_31 = arith.constant 0 : index
    %c0_32 = arith.constant 0 : index
    %37 = vector.load %arg3[%c1_30, %c0_31, %c0_32] : memref<3x128x128xf32, #tpu.memory_space<vmem>>, vector<1x128x128xf32>
    %38 = vector.shape_cast %37 : vector<1x128x128xf32> to vector<128x128xf32>
    %cst_33 = arith.constant dense<0.000000e+00> : vector<64x128xf32>
    %39 = tpu.matmul %34, %38, %cst_33 {dimension_numbers = #tpu.dot_dimension_numbers<[1], [0], [0], [1], [0, 0, 1, 1], [], []>} : vector<64x128xf32>, vector<128x128xf32>, vector<64x128xf32> -> vector<64x128xf32>
    %c0_34 = arith.constant 0 : index
    %c0_35 = arith.constant 0 : index
    %c0_36 = arith.constant 0 : index
    %40 = vector.load %arg3[%c0_34, %c0_35, %c0_36] : memref<3x128x128xf32, #tpu.memory_space<vmem>>, vector<1x128x128xf32>
    %41 = vector.shape_cast %40 : vector<1x128x128xf32> to vector<128x128xf32>
    %cst_37 = arith.constant dense<0.000000e+00> : vector<64x128xf32>
    %42 = tpu.matmul %35, %41, %cst_37 {dimension_numbers = #tpu.dot_dimension_numbers<[1], [0], [0], [1], [0, 0, 1, 1], [], []>} : vector<64x128xf32>, vector<128x128xf32>, vector<64x128xf32> -> vector<64x128xf32>
    %43 = arith.addf %39, %42 : vector<64x128xf32>
    %c2_38 = arith.constant 2 : index
    %c0_39 = arith.constant 0 : index
    %c0_40 = arith.constant 0 : index
    %44 = vector.load %arg3[%c2_38, %c0_39, %c0_40] : memref<3x128x128xf32, #tpu.memory_space<vmem>>, vector<1x128x128xf32>
    %45 = vector.shape_cast %44 : vector<1x128x128xf32> to vector<128x128xf32>
    %cst_41 = arith.constant dense<0.000000e+00> : vector<64x128xf32>
    %46 = tpu.matmul %36, %45, %cst_41 {dimension_numbers = #tpu.dot_dimension_numbers<[1], [0], [0], [1], [0, 0, 1, 1], [], []>} : vector<64x128xf32>, vector<128x128xf32>, vector<64x128xf32> -> vector<64x128xf32>
    %47 = arith.addf %43, %46 : vector<64x128xf32>
    %c3 = arith.constant 3 : index
    %c0_42 = arith.constant 0 : index
    %48 = vector.load %arg5[%c3, %c0_42] : memref<8x128xf32, #tpu.memory_space<vmem>>, vector<1x128xf32>
    %49 = vector.broadcast %48 : vector<1x128xf32> to vector<64x128xf32>
    %50 = arith.addf %47, %49 : vector<64x128xf32>
    %cst_43 = arith.constant 0.000000e+00 : f32
    %51 = vector.broadcast %cst_43 : f32 to vector<64x128xf32>
    %52 = arith.maximumf %50, %51 : vector<64x128xf32>
    %c4 = arith.constant 4 : index
    %c0_44 = arith.constant 0 : index
    %53 = vector.load %arg5[%c4, %c0_44] : memref<8x128xf32, #tpu.memory_space<vmem>>, vector<1x128xf32>
    %54 = vector.broadcast %53 : vector<1x128xf32> to vector<64x128xf32>
    %55 = arith.mulf %52, %54 : vector<64x128xf32>
    %c5 = arith.constant 5 : index
    %c0_45 = arith.constant 0 : index
    %56 = vector.load %arg5[%c5, %c0_45] : memref<8x128xf32, #tpu.memory_space<vmem>>, vector<1x128xf32>
    %57 = vector.broadcast %56 : vector<1x128xf32> to vector<64x128xf32>
    %58 = arith.addf %55, %57 : vector<64x128xf32>
    %c0_46 = arith.constant 0 : index
    %c0_47 = arith.constant 0 : index
    %59 = vector.load %arg6[%c0_46, %c0_47] : memref<64x128xf32, #tpu.memory_space<vmem>>, vector<64x128xf32>
    tpu.vector_store %arg6[%c0_46, %c0_47], %58 {strides = array<i32>} : memref<64x128xf32, #tpu.memory_space<vmem>>, vector<64x128xf32>,
    return
  }
  func.func @transform_0(%arg0: i32) -> (i32, i32) {
    %c0_i32 = arith.constant 0 : i32
    %c0_i32_0 = arith.constant 0 : i32
    return %arg0, %c0_i32 : i32, i32
  }
  func.func @transform_1(%arg0: i32) -> (i32, i32, i32) {
    %c0_i32 = arith.constant 0 : i32
    %c0_i32_0 = arith.constant 0 : i32
    %c0_i32_1 = arith.constant 0 : i32
    %c0_i32_2 = arith.constant 0 : i32
    return %c0_i32, %c0_i32_0, %c0_i32_1 : i32, i32, i32
  }
  func.func @transform_2(%arg0: i32) -> (i32, i32, i32) {
    %c0_i32 = arith.constant 0 : i32
    %c0_i32_0 = arith.constant 0 : i32
    %c0_i32_1 = arith.constant 0 : i32
    %c0_i32_2 = arith.constant 0 : i32
    return %c0_i32, %c0_i32_0, %c0_i32_1 : i32, i32, i32
  }
  func.func @transform_3(%arg0: i32) -> (i32, i32, i32) {
    %c0_i32 = arith.constant 0 : i32
    %c0_i32_0 = arith.constant 0 : i32
    %c0_i32_1 = arith.constant 0 : i32
    %c0_i32_2 = arith.constant 0 : i32
    return %c0_i32, %c0_i32_0, %c0_i32_1 : i32, i32, i32
  }
  func.func @transform_4(%arg0: i32) -> (i32, i32) {
    %c0_i32 = arith.constant 0 : i32
    %c0_i32_0 = arith.constant 0 : i32
    %c0_i32_1 = arith.constant 0 : i32
    return %c0_i32, %c0_i32_0 : i32, i32
  }
  func.func @transform_5(%arg0: i32) -> (i32, i32) {
    %c0_i32 = arith.constant 0 : i32
    %c0_i32_0 = arith.constant 0 : i32
    return %arg0, %c0_i32 : i32, i32
  }
}

</mosaic_0001>

<bundles_post_ra>
// kernel: tpu_custom_call.1
= control target key start
LH: loop header
LB: loop body
LE: loop exit
PB: predicated region body
PF: predicated region fallthrough
CT: control target
= control target key end

     0   :  { %10 = vsyncpa [#allocation3], 0  ;;  %s3117_s0 = inlined_call_operand.vmem [shape: f32[512,32], index: 0, kind: input, shape index: {}]   ;;  %s3118_s1 = inlined_call_operand.vmem [shape: f32[3,32,128], index: 1, kind: input, shape index: {}]   ;;  %s3119_s2 = inlined_call_operand.vmem [shape: f32[3,128,128], index: 2, kind: input, shape index: {}]   ;;  %s3120_s3 = inlined_call_operand.vmem [shape: f32[2,64,64], index: 3, kind: input, shape index: {}]   ;;  %s3121_s4 = inlined_call_operand.vmem [shape: f32[8,128], index: 4, kind: input, shape index: {}]   ;;  %s3122_s5 = inlined_call_operand.hbm [shape: f32[128,128], index: 5, kind: output, shape index: {}]  }
   0x1   :  { %12 = vsyncpa [#allocation3 + $0x1], 0  ;;  %s2480_s18 = smov 0   ;;  %s2482_s19 = smov 0  }
   0x2   :  { %s2484_s20 = smov 0   ;;  %s2486_s21 = smov 0  }
   0x3 LB: > { %s2501_s22 = sadd.s32 4294967295, %s2445_s21   ;;  %s1729_s23 = sadd.s32 4294967294, %s2445_s21   ;;  %s2445_s21 = sphi %s2486_s21, %s3128_s21   ;;  %s2441_s20 = sphi %s2484_s20, %s3127_s20   ;;  %s2437_s19 = sphi %s2482_s19, %s3126_s19   ;;  %s2433_s18 = sphi %s2480_s18, %s3125_s18  }
   0x4   : > { %s2505_s24 = sadd.s32 1, %s2445_s21   ;;  %s135_s25 = sadd.s32 1, %s2441_s20 }
   0x5   : > { %s132_s26 = ssub.s32 %s2445_s21, %s2505_s24  ;;  %p145_p0 = scmp.ne.s32.totalorder %s2441_s20, %s2437_s19 }
   0x6   : > { %p133_p1 = scmp.eq.s32.totalorder %s132_s26, 0  ;;  %p146_p2 = scmp.eq.s32.totalorder %s2501_s22, 1 }
   0x7   : > { %p151_p3 = scmp.ne.s32.totalorder %s2437_s19, %s2433_s18  ;;  %p152_p4 = scmp.eq.s32.totalorder %s1729_s23, 1 }
   0x8   : > { %s2516_s27 = scalar_select %p133_p1, %s2441_s20, %s135_s25  }
   0x9   : > { %p2518_p5 = por %p146_p2, %p145_p0  ;;  %p2522_p6 = por %p152_p4, %p151_p3 }
   0xa   : > { %p1732_p7 = scmp.ge.s32.totalorder %s2445_s21, 1  ;;  %p191_p8 = scmp.lt.s32.totalorder %s2445_s21, 3 }
   0xc   : > { %p192_p9 = pnand %p1732_p7, %p191_p8 }
   0xd   : > { %s1734_s30 = sshll.u32 (!%p192_p9), %s2501_s22, 5  ;;  %s1851_s17 = sshll.u32 (!%p192_p9), %s2501_s22, 10 }
   0xe   : > { %195 = sbr.rel (%p192_p9) target bundleno = 948 (0x3b4), region = 40  ;;  %p220_p10 = scmp.lt.s32.totalorder (!%p192_p9), %s1734_s30, 63 }
   0xf   : > { %s2447_s7 = smov (!%p192_p9), [#allocation2]  }
  0x10   : > { %s2389_s8 = sshll.u32 (!%p192_p9), %s2447_s7, 4  ;;  %s2390_s8 = int_to_ptr.vmem [resolvable:$false] %s2389_s8 }
  0x11   : > { %s2391_s9 = scalar_lea.vmem (!%p192_p9), %s2390_s8, 2048 }
  0x13   : > { %v2532_v0 = vld [vmem:[%s3120_s3] sm:$0xff]  ;;  %vm299_vm0 = vcmask 523264   ;;  %s3130_s30 = smov (!%p220_p10, %s1734_s30), 63  ;;  %v2626_v58 = vld [vmem:[%s3120_s3 + $0x8] sm:$0xff]  ;;  %v2633_v59 = vld [vmem:[%s3120_s3 + $0x10] sm:$0xff]  ;;  %vm567_vm1 = vcmask 261120  }
  0x14   : > { %2040 = vmatprep.mubr.msk.f32.mxu0 %vm299_vm0, %v2532_v0  ;;  %v2539_v1 = vld [vmem:[%s3120_s3 + $0x60] sm:$0xff]  ;;  %s1735_s10 = sshll.u32 %s3130_s30, 3  ;;  %v2641_v60 = vld [vmem:[%s3120_s3 + $0x68] sm:$0xff]  ;;  %v2649_v61 = vld [vmem:[%s3120_s3 + $0x70] sm:$0xff]  ;;  %s3069_s30 = scalar_lea.hbm %s3122_s5, %s1851_s17 }
  0x15   : > { %2074 = vmatprep.mubr.msk.f32.mxu1 %vm299_vm0, %v2539_v1  ;;  %s2546_s13 = scalar_lea.vmem %s3117_s0, %s1735_s10  ;;  %v2657_v62 = vld [vmem:[%s3120_s3 + $0x18] sm:$0xff]  ;;  %v2663_v63 = vld [vmem:[%s3120_s3 + $0x20] sm:$0xff]  ;;  %s216_s10 = sand.u32 1, %s2437_s19  }
  0x16   : > { %v233_v2 = vld [vmem:[%s2546_s13 + $0x38] sm:$0xff]  ;;  %v232_v7 = vld [vmem:[%s2546_s13 + $0x30] sm:$0xff]  ;;  %v231_v13 = vld [vmem:[%s2546_s13 + $0x28] sm:$0xff]  ;;  %s3077_s22 = scalar_lea.sflag [#allocation3], %s216_s10 }
  0x17   : > { %v241_v3 = vld [vmem:[%s2546_s13 + $0x78] sm:$0xff]  ;;  %v240_v8 = vld [vmem:[%s2546_s13 + $0x70] sm:$0xff]  ;;  %v239_v15 = vld [vmem:[%s2546_s13 + $0x68] sm:$0xff] }
  0x18   : > { %v257_v4 = vld [vmem:[%s2546_s13 + $0xb8] sm:$0xff]  ;;  %v249_v5 = vmax.f32 %v233_v2, %v241_v3  ;;  %v248_v10 = vmax.f32 %v232_v7, %v240_v8  ;;  %v256_v11 = vld [vmem:[%s2546_s13 + $0xb0] sm:$0xff]  ;;  %v255_v16 = vld [vmem:[%s2546_s13 + $0xa8] sm:$0xff]  ;;  %v247_v19 = vmax.f32 %v231_v13, %v239_v15 }
  0x19   : > { %v265_v6 = vld [vmem:[%s2546_s13 + $0xf8] sm:$0xff]  ;;  %v264_v12 = vld [vmem:[%s2546_s13 + $0xf0] sm:$0xff]  ;;  %v263_v17 = vld [vmem:[%s2546_s13 + $0xe8] sm:$0xff] }
  0x1a   : > { %v273_v9 = vmax.f32 %v257_v4, %v265_v6  ;;  %v272_v14 = vmax.f32 %v256_v11, %v264_v12  ;;  %v271_v20 = vmax.f32 %v255_v16, %v263_v17  ;;  %v230_v21 = vld [vmem:[%s2546_s13 + $0x20] sm:$0xff]  ;;  %v229_v27 = vld [vmem:[%s2546_s13 + $0x18] sm:$0xff]  ;;  %v228_v34 = vld [vmem:[%s2546_s13 + $0x10] sm:$0xff] }
  0x1b   : > { %v238_v22 = vld [vmem:[%s2546_s13 + $0x60] sm:$0xff]  ;;  %v237_v28 = vld [vmem:[%s2546_s13 + $0x58] sm:$0xff]  ;;  %v236_v36 = vld [vmem:[%s2546_s13 + $0x50] sm:$0xff] }
  0x1c   : > { %v2560_v18 = vmax.f32 %v249_v5, %v273_v9  ;;  %v254_v23 = vld [vmem:[%s2546_s13 + $0xa0] sm:$0xff]  ;;  %v2565_v24 = vmax.f32 %v248_v10, %v272_v14  ;;  %v246_v25 = vmax.f32 %v230_v21, %v238_v22  ;;  %v2571_v29 = vmax.f32 %v247_v19, %v271_v20  ;;  %v253_v32 = vld [vmem:[%s2546_s13 + $0x98] sm:$0xff]  ;;  %v252_v37 = vld [vmem:[%s2546_s13 + $0x90] sm:$0xff] }
  0x1d   : > { %v262_v26 = vld [vmem:[%s2546_s13 + $0xe0] sm:$0xff]  ;;  %v245_v31 = vmax.f32 %v229_v27, %v237_v28  ;;  %v261_v33 = vld [vmem:[%s2546_s13 + $0xd8] sm:$0xff]  ;;  %v260_v38 = vld [vmem:[%s2546_s13 + $0xd0] sm:$0xff]  ;;  %v244_v40 = vmax.f32 %v228_v34, %v236_v36 }
  0x1e   : > { %2024 = vmatprep.subr.mxu0 %v2560_v18  ;;  %v270_v30 = vmax.f32 %v254_v23, %v262_v26  ;;  %2328 = vmatprep.subr.mxu1 %v2560_v18  ;;  %v269_v35 = vmax.f32 %v253_v32, %v261_v33  ;;  %v268_v41 = vmax.f32 %v252_v37, %v260_v38  ;;  %v227_v42 = vld [vmem:[%s2546_s13 + $0x8] sm:$0xff]  ;;  %v226_v46 = vld [vmem:[%s2546_s13] sm:$0xff]  ;;  %v2673_v2 = vld [vmem:[%s3120_s3 + $0x78] sm:$0xff] }
  0x1f   : > { %2025 = vmatpush3.msra.mxu0 %v2560_v18  ;;  %2336 = vmatpush3.msra.mxu1 %v2560_v18  ;;  %v235_v43 = vld [vmem:[%s2546_s13 + $0x48] sm:$0xff]  ;;  %v234_v47 = vld [vmem:[%s2546_s13 + $0x40] sm:$0xff]  ;;  %v1763_v3 = vld [vmem:[%s3118_s1 + $0x38] sm:$0xff] }
  0x20   : > { %2026 = vmatprep.subr.mxu0 %v2565_v24  ;;  %v2583_v39 = vmax.f32 %v246_v25, %v270_v30  ;;  %v251_v44 = vld [vmem:[%s2546_s13 + $0x88] sm:$0xff]  ;;  %2329 = vmatprep.subr.mxu1 %v2565_v24  ;;  %v2595_v48 = vmax.f32 %v245_v31, %v269_v35  ;;  %v243_v49 = vmax.f32 %v227_v42, %v235_v43  ;;  %v250_v51 = vld [vmem:[%s2546_s13 + $0x80] sm:$0xff]  ;;  %v2693_v5 = vld [vmem:[%s3120_s3 + $0x30] sm:$0xff] }
  0x21   : > { %2027 = vmatpush3.msra.mxu0 %v2565_v24  ;;  %v259_v45 = vld [vmem:[%s2546_s13 + $0xc8] sm:$0xff]  ;;  %2337 = vmatpush3.msra.mxu1 %v2565_v24  ;;  %v258_v52 = vld [vmem:[%s2546_s13 + $0xc0] sm:$0xff]  ;;  %v2603_v53 = vmax.f32 %v244_v40, %v268_v41  ;;  %v242_v54 = vmax.f32 %v226_v46, %v234_v47  ;;  %v1762_v6 = vld [vmem:[%s3118_s1 + $0x30] sm:$0xff]  ;;  %s1733_s13 = sshll.u32 %s216_s10, 6 }
  0x22   : > { %2028 = vmatprep.subr.mxu0 %v2571_v29  ;;  %v267_v50 = vmax.f32 %v251_v44, %v259_v45  ;;  %2330 = vmatprep.subr.mxu1 %v2571_v29  ;;  %v266_v55 = vmax.f32 %v250_v51, %v258_v52  ;;  %v2687_v4 = vld [vmem:[%s3120_s3 + $0x28] sm:$0xff]  ;;  %v2710_v7 = vld [vmem:[%s3120_s3 + $0x38] sm:$0xff]  ;;  %v2716_v8 = vld [vmem:[%s3120_s3 + $0x40] sm:$0xff]  ;;  %s3056_s16 = scalar_lea.vmem [#allocation2], %s1733_s13 }
  0x23   : > { %2029 = vmatpush3.msra.mxu0 %v2571_v29  ;;  %2338 = vmatpush3.msra.mxu1 %v2571_v29  ;;  %v2728_v9 = vld [vmem:[%s3120_s3 + $0x48] sm:$0xff]  ;;  %v566_v10 = vld [vmem:[%s3118_s1 + $0x18] sm:$0xff]  ;;  %v2737_v11 = vld [vmem:[%s3120_s3 + $0x50] sm:$0xff]  ;;  %s1667_s23 = sshll.u32 %s3056_s16, 4  ;;  %s3071_s23 = int_to_ptr.vmem [resolvable:$true] %s1667_s23 }
  0x24   : > { %2030 = vmatprep.subr.mxu0 %v2583_v39  ;;  %2331 = vmatprep.subr.mxu1 %v2583_v39  ;;  %v2609_v56 = vmax.f32 %v243_v49, %v267_v50  ;;  %v2615_v57 = vmax.f32 %v242_v54, %v266_v55  ;;  %v565_v12 = vld [vmem:[%s3118_s1 + $0x10] sm:$0xff]  ;;  %v2750_v13 = vld [vmem:[%s3120_s3 + $0x58] sm:$0xff]  ;;  %v564_v14 = vld [vmem:[%s3118_s1 + $0x8] sm:$0xff]  ;;  %s2385_s6 = scalar_lea.vmem %s3071_s23, 1024  ;;  %p2392_p0 = scmp.lt.s32.totalorder %s3071_s23, %s2390_s8 }
  0x25   : > { %2031 = vmatpush3.msra.mxu0 %v2583_v39  ;;  %2339 = vmatpush3.msra.mxu1 %v2583_v39  ;;  %v1761_v15 = vld [vmem:[%s3118_s1 + $0x28] sm:$0xff]  ;;  %v563_v16 = vld [vmem:[%s3118_s1] sm:$0xff]  ;;  %v1783_v19 = vld [vmem:[%s3118_s1 + $0x58] sm:$0xff]  ;;  %p2386_p11 = scmp.ne.s32.totalorder %s3071_s23, %s2385_s6  ;;  %p2393_p1 = scmp.lt.s32.totalorder %s2391_s9, %s2385_s6 }
  0x26   : > { %2032 = vmatprep.subr.mxu0 %v2595_v48  ;;  %2332 = vmatprep.subr.mxu1 %v2595_v48  ;;  %v1760_v17 = vld [vmem:[%s3118_s1 + $0x20] sm:$0xff]  ;;  %v1782_v22 = vld [vmem:[%s3118_s1 + $0x50] sm:$0xff] }
  0x27   : > { %2033 = vmatpush3.msra.mxu0 %v2595_v48  ;;  %2340 = vmatpush3.msra.mxu1 %v2595_v48  ;;  %p2387_p12 = pnand %p2386_p11, %p2518_p5  ;;  %p2394_p2 = por %p2393_p1, %p2392_p0 }
  0x28   : > { %2034 = vmatprep.subr.mxu0 %v2603_v53  ;;  %2333 = vmatprep.subr.mxu1 %v2603_v53 }
  0x29   : > { %2035 = vmatpush3.msra.mxu0 %v2603_v53  ;;  %2341 = vmatpush3.msra.mxu1 %v2603_v53  ;;  %p2388_p13 = pneg %p2387_p12 }
  0x2a   : > { %2036 = vmatprep.subr.mxu0 %v2609_v56  ;;  %2334 = vmatprep.subr.mxu1 %v2609_v56 }
  0x2b   : > { %2037 = vmatpush3.msra.mxu0 %v2609_v56  ;;  %2342 = vmatpush3.msra.mxu1 %v2609_v56  ;;  %p2395_p3 = pnand %p2394_p2, %p2388_p13 }
  0x2c   : > { %2038 = vmatprep.subr.mxu0 %v2615_v57  ;;  %2335 = vmatprep.subr.mxu1 %v2615_v57 }
  0x2d   : > { %2039 = vmatpush3.msra.mxu0 %v2615_v57  ;;  %2343 = vmatpush3.msra.mxu1 %v2615_v57 }
  0x2e   : > { %2041 = vmatmul.mubr.msk.f32.vlgmr.msra.gmra.mxu0 %vm299_vm0, %v2626_v58  ;;  %2052 = vmatprep.subr.mxu0 %v2560_v18 }
  0x2f   : > { %2053 = vmatpush3.msra.mxu0 %v2560_v18  ;;  %2043 = vmatprep.mubr.msk.f32.mxu0 %vm299_vm0, %v2633_v59 }
  0x30   : > { %2054 = vmatprep.subr.mxu0 %v2565_v24  ;;  %2075 = vmatmul.mubr.msk.f32.vlgmr.msra.gmra.mxu1 %vm299_vm0, %v2641_v60 }
  0x31   : > { %2055 = vmatpush3.msra.mxu0 %v2565_v24  ;;  %2077 = vmatprep.mubr.msk.f32.mxu1 %vm299_vm0, %v2649_v61 }
  0x32   : > { %2044 = vmatmul.mubr.msk.f32.gmra.mxu0 %vm299_vm0, %v2657_v62  ;;  %2056 = vmatprep.subr.mxu0 %v2571_v29 }
  0x33   : > { %2057 = vmatpush3.msra.mxu0 %v2571_v29  ;;  %2046 = vmatprep.mubr.msk.f32.mxu0 %vm299_vm0, %v2663_v63 }
  0x34   : > { %2058 = vmatprep.subr.mxu0 %v2583_v39  ;;  %2078 = vmatmul.mubr.msk.f32.gmra.mxu1 %vm299_vm0, %v2673_v2 }
  0x35   : > { %2059 = vmatpush3.msra.mxu0 %v2583_v39  ;;  %2100 = vmatprep.subr.mxu1 %v1763_v3 }
  0x36   : > { %2047 = vmatmul.mubr.msk.f32.gmra.mxu0 %vm299_vm0, %v2687_v4  ;;  %2060 = vmatprep.subr.mxu0 %v2595_v48 }
  0x37   : > { %2061 = vmatpush3.msra.mxu0 %v2595_v48  ;;  %2049 = vmatprep.mubr.msk.f32.mxu0 %vm299_vm0, %v2693_v5 }
  0x38   : > { %2062 = vmatprep.subr.mxu0 %v2603_v53  ;;  %2101 = vmatpush3.msra.mxu1 %v1763_v3 }
  0x39   : > { %2063 = vmatpush3.msra.mxu0 %v2603_v53  ;;  %2102 = vmatprep.subr.mxu1 %v1762_v6 }
  0x3a   : > { %2050 = vmatmul.mubr.msk.f32.gmra.mxu0 %vm299_vm0, %v2710_v7  ;;  %2064 = vmatprep.subr.mxu0 %v2609_v56 }
  0x3b   : > { %2065 = vmatpush3.msra.mxu0 %v2609_v56  ;;  %2068 = vmatprep.mubr.msk.f32.mxu0 %vm299_vm0, %v2716_v8 }
  0x3c   : > { %2066 = vmatprep.subr.mxu0 %v2615_v57  ;;  %2103 = vmatpush3.msra.mxu1 %v1762_v6 }
  0x3d   : > { %2067 = vmatpush3.msra.mxu0 %v2615_v57  ;;  %2104 = vmatprep.subr.mxu1 %v1761_v15 }
  0x3e   : > { %2069 = vmatmul.mubr.msk.f32.vlgmr.msra.gmra.mxu0 %vm299_vm0, %v2728_v9  ;;  %2080 = vmatprep.subr.mxu0 %v566_v10 }
  0x3f   : > { %2071 = vmatprep.mubr.msk.f32.mxu0 %vm299_vm0, %v2737_v11  ;;  %2081 = vmatpush3.msra.mxu0 %v566_v10 }
  0x40   : > { %2082 = vmatprep.subr.mxu0 %v565_v12  ;;  %2105 = vmatpush3.msra.mxu1 %v1761_v15 }
  0x41   : > { %2083 = vmatpush3.msra.mxu0 %v565_v12  ;;  %2106 = vmatprep.subr.mxu1 %v1760_v17 }
  0x42   : > { %2072 = vmatmul.mubr.msk.f32.gmra.mxu0 %vm299_vm0, %v2750_v13  ;;  %2084 = vmatprep.subr.mxu0 %v564_v14 }
  0x43   : > { %2085 = vmatpush3.msra.mxu0 %v564_v14  ;;  %2107 = vmatpush3.msra.mxu1 %v1760_v17  ;;  %v1792_v17 = vld [vmem:[%s3121_s4] ss:$0 sm:$0xff] }
  0x44   : > { %2086 = vmatprep.subr.mxu0 %v563_v16  ;;  %2108 = vmatprep.mubr.msk.f32.mxu1 %vm567_vm1, %v2615_v57 }
  0x45   : > { %2087 = vmatpush3.msra.mxu0 %v563_v16  ;;  %2109 = vmatmul.mubr.msk.f32.vlgmr.msra.gmra.mxu1 %vm567_vm1, %v2609_v56 }
  0x46   : > { %2120 = vmatprep.subr.mxu0 %v1783_v19  ;;  %2111 = vmatprep.mubr.msk.f32.mxu1 %vm567_vm1, %v2603_v53 }
  0x49   : > { %2112 = vmatmul.mubr.msk.f32.gmra.mxu1 %vm567_vm1, %v2595_v48 }
  0x4a   : > { %2114 = vmatprep.mubr.msk.f32.mxu1 %vm567_vm1, %v2583_v39 }
  0x4d   : > { %2115 = vmatmul.mubr.msk.f32.gmra.mxu1 %vm567_vm1, %v2571_v29 }
  0x4e   : > { %2117 = vmatprep.mubr.msk.f32.mxu1 %vm567_vm1, %v2565_v24  ;;  %v1781_v24 = vld [vmem:[%s3118_s1 + $0x48] sm:$0xff] }
  0x51   : > { %2118 = vmatmul.mubr.msk.f32.gmra.mxu1 %vm567_vm1, %v2560_v18 }
  0x52   : > { %2156 = vmatprep.mubr.msk.f32.mxu1 %vm299_vm0, %v2532_v0  ;;  %v1780_v0 = vld [vmem:[%s3118_s1 + $0x40] sm:$0xff] }
  0xee   : > { %v2042_v20 = vpop.f32.mrf.mxu0 }
  0xf0   : > { %v390_v21 = vpop.f32.mrf.mxu0  ;;  %v2076_v29 = vpop.f32.mrf.mxu1 }
  0xf1   : > { %2088 = vmatprep.mubr.msk.f32.mxu0 %vm567_vm1, %v390_v21 }
  0xf2   : > { %v2045_v23 = vpop.f32.mrf.mxu0  ;;  %2089 = vmatmul.mubr.msk.f32.vlgmr.msra.gmra.mxu0 %vm567_vm1, %v2042_v20  ;;  %v539_v32 = vpop.f32.mrf.mxu1 }
  0xf3   : > { %2121 = vmatpush3.msra.mxu0 %v1783_v19 }
  0xf4   : > { %v400_v18 = vpop.f32.mrf.mxu0  ;;  %2122 = vmatprep.subr.mxu0 %v1782_v22  ;;  %v2079_v35 = vpop.f32.mrf.mxu1 }
  0xf5   : > { %2091 = vmatprep.mubr.msk.f32.mxu0 %vm567_vm1, %v400_v18  ;;  %2123 = vmatpush3.msra.mxu0 %v1782_v22 }
  0xf6   : > { %v2048_v25 = vpop.f32.mrf.mxu0  ;;  %2092 = vmatmul.mubr.msk.f32.gmra.mxu0 %vm567_vm1, %v2045_v23  ;;  %2124 = vmatprep.subr.mxu0 %v1781_v24  ;;  %v549_v36 = vpop.f32.mrf.mxu1 }
  0xf7   : > { %2125 = vmatpush3.msra.mxu0 %v1781_v24 }
  0xf8   : > { %v410_v26 = vpop.f32.mrf.mxu0  ;;  %2126 = vmatprep.subr.mxu0 %v1780_v0 }
  0xf9   : > { %2094 = vmatprep.mubr.msk.f32.mxu0 %vm567_vm1, %v410_v26  ;;  %2127 = vmatpush3.msra.mxu0 %v1780_v0 }
  0xfa   : > { %v2051_v27 = vpop.f32.mrf.mxu0  ;;  %2095 = vmatmul.mubr.msk.f32.gmra.mxu0 %vm567_vm1, %v2048_v25 }
  0xfc   : > { %v420_v28 = vpop.f32.mrf.mxu0 }
  0xfd   : > { %2097 = vmatprep.mubr.msk.f32.mxu0 %vm567_vm1, %v420_v28 }
  0xfe   : > { %v2070_v30 = vpop.f32.mrf.mxu0  ;;  %2098 = vmatmul.mubr.msk.f32.gmra.mxu0 %vm567_vm1, %v2051_v27 }
 0x100   : > { %v519_v31 = vpop.f32.mrf.mxu0 }
 0x101   : > { %2128 = vmatprep.mubr.msk.f32.mxu0 %vm567_vm1, %v519_v31 }
 0x102   : > { %v2073_v33 = vpop.f32.mrf.mxu0  ;;  %2129 = vmatmul.mubr.msk.f32.vlgmr.msra.gmra.mxu0 %vm567_vm1, %v2070_v30 }
 0x104   : > { %v529_v34 = vpop.f32.mrf.mxu0 }
 0x105   : > { %2131 = vmatprep.mubr.msk.f32.mxu0 %vm567_vm1, %v529_v34  ;;  %v2110_v37 = vpop.f32.mrf.mxu1  ;;  %v1793_v34 = vld [vmem:[%s3121_s4 + $0x1] ss:$0 sm:$0xff] }
 0x106   : > { %2132 = vmatmul.mubr.msk.f32.gmra.mxu0 %vm567_vm1, %v2073_v33 }
 0x107   : > { %2134 = vmatprep.mubr.msk.f32.mxu0 %vm567_vm1, %v539_v32  ;;  %v787_v40 = vpop.f32.mrf.mxu1 }
 0x109   : > { %v2113_v42 = vpop.f32.mrf.mxu1 }
 0x10a   : > { %2135 = vmatmul.mubr.msk.f32.gmra.mxu0 %vm567_vm1, %v2076_v29 }
 0x10b   : > { %2137 = vmatprep.mubr.msk.f32.mxu0 %vm567_vm1, %v549_v36  ;;  %v797_v45 = vpop.f32.mrf.mxu1 }
 0x10d   : > { %v2116_v48 = vpop.f32.mrf.mxu1 }
 0x10e   : > { %2138 = vmatmul.mubr.msk.f32.gmra.mxu0 %vm567_vm1, %v2079_v35 }
 0x10f   : > { %2184 = vmatprep.mubr.msk.f32.mxu0 %vm299_vm0, %v2716_v8  ;;  %v807_v51 = vpop.f32.mrf.mxu1 }
 0x111   : > { %v2119_v54 = vpop.f32.mrf.mxu1 }
 0x113   : > { %v817_v6 = vpop.f32.mrf.mxu1 }
 0x1b2   : > { %v2090_v38 = vpop.f32.mrf.mxu0 }
 0x1b3   : > { %v793_v24 = vadd.f32 %v2110_v37, %v2090_v38 }
 0x1b4   : > { %v658_v39 = vpop.f32.mrf.mxu0 }
 0x1b5   : > { %v788_v28 = vadd.f32 %v787_v40, %v658_v39 }
 0x1b6   : > { %v2093_v41 = vpop.f32.mrf.mxu0 }
 0x1b7   : > { %v803_v12 = vadd.f32 %v2113_v42, %v2093_v41 }
 0x1b8   : > { %v668_v43 = vpop.f32.mrf.mxu0 }
 0x1b9   : > { %v798_v16 = vadd.f32 %v797_v45, %v668_v43  ;;  %v1794_v43 = vld [vmem:[%s3121_s4 + $0x2] ss:$0 sm:$0xff] }
 0x1ba   : > { %v2096_v44 = vpop.f32.mrf.mxu0 }
 0x1bb   : > { %v813_v56 = vadd.f32 %v2116_v48, %v2096_v44 }
 0x1bc   : > { %v678_v46 = vpop.f32.mrf.mxu0 }
 0x1bd   : > { %v808_v3 = vadd.f32 %v807_v51, %v678_v46 }
 0x1be   : > { %v2099_v47 = vpop.f32.mrf.mxu0 }
 0x1bf   : > { %v823_v14 = vadd.f32 %v2119_v54, %v2099_v47 }
 0x1c0   : > { %v688_v49 = vpop.f32.mrf.mxu0 }
 0x1c1   : > { %v818_v20 = vadd.f32 %v817_v6, %v688_v49 }
 0x1c2   : > { %v2130_v50 = vpop.f32.mrf.mxu0 }
 0x1c3   : > { %v961_v29 = vadd.f32 %v2130_v50, %v793_v24  ;;  %v1811_v24 = vld [vmem:[%s3119_s2 + $0x80] sm:$0xff] }
 0x1c4   : > { %v921_v52 = vpop.f32.mrf.mxu0 }
 0x1c5   : > { %v960_v35 = vadd.f32 %v921_v52, %v788_v28  ;;  %v974_v38 = vadd.f32 %v1792_v17, %v961_v29  ;;  %v1243_v28 = vld [vmem:[%s3119_s2 + $0x8] sm:$0xff]  ;;  %v1242_v29 = vld [vmem:[%s3119_s2] sm:$0xff] }
 0x1c6   : > { %v2133_v53 = vpop.f32.mrf.mxu0 }
 0x1c7   : > { %v963_v21 = vadd.f32 %v2133_v53, %v803_v12  ;;  %v973_v46 = vadd.f32 %v1792_v17, %v960_v35  ;;  %v982_v50 = vmax.f32 %v974_v38, 0.0  ;;  %v1826_v12 = vld [vmem:[%s3119_s2 + $0xf8] sm:$0xff]  ;;  %v1840_v35 = vld [vmem:[%s3119_s2 + $0x168] sm:$0xff] }
 0x1c8   : > { %v931_v55 = vpop.f32.mrf.mxu0 }
 0x1c9   : > { %v962_v0 = vadd.f32 %v931_v55, %v798_v16  ;;  %v976_v30 = vadd.f32 %v1792_v17, %v963_v21  ;;  %v981_v53 = vmax.f32 %v973_v46, 0.0  ;;  %v1252_v16 = vld [vmem:[%s3119_s2 + $0x50] sm:$0xff]  ;;  %v1250_v21 = vld [vmem:[%s3119_s2 + $0x40] sm:$0xff] }
 0x1ca   : > { %v2136_v57 = vpop.f32.mrf.mxu0  ;;  %v1835_v46 = vld [vmem:[%s3119_s2 + $0x140] sm:$0xff] }
 0x1cb   : > { %v965_v8 = vadd.f32 %v2136_v57, %v813_v56  ;;  %v975_v36 = vadd.f32 %v1792_v17, %v962_v0  ;;  %v984_v39 = vmax.f32 %v976_v30, 0.0  ;;  %v995_v56 = vmul.f32 %v1793_v34, %v982_v50  ;;  %v1247_v0 = vld [vmem:[%s3119_s2 + $0x28] sm:$0xff]  ;;  %v1842_v30 = vld [vmem:[%s3119_s2 + $0x178] sm:$0xff] }
 0x1cc   : > { %v941_v10 = vpop.f32.mrf.mxu0  ;;  %v1832_v50 = vld [vmem:[%s3119_s2 + $0x128] sm:$0xff] }
 0x1cd   : > { %v964_v15 = vadd.f32 %v941_v10, %v808_v3  ;;  %v978_v22 = vadd.f32 %v1792_v17, %v965_v8  ;;  %v983_v47 = vmax.f32 %v975_v36, 0.0  ;;  %v997_v51 = vmul.f32 %v1793_v34, %v984_v39 }
 0x1ce   : > { %v2139_v19 = vpop.f32.mrf.mxu0  ;;  %v994_v3 = vmul.f32 %v1793_v34, %v981_v53  ;;  %v2855_v8 = vadd.f32 %v1794_v43, %v995_v56  ;;  %v1830_v53 = vld [vmem:[%s3119_s2 + $0x118] sm:$0xff]  ;;  %v1828_v56 = vld [vmem:[%s3119_s2 + $0x108] sm:$0xff] }
 0x1cf   : > { %v967_v23 = vadd.f32 %v2139_v19, %v823_v14  ;;  %v977_v25 = vadd.f32 %v1792_v17, %v964_v15  ;;  %v986_v31 = vmax.f32 %v978_v22, 0.0  ;;  %v996_v54 = vmul.f32 %v1793_v34, %v983_v47  ;;  %v1825_v14 = vld [vmem:[%s3119_s2 + $0xf0] sm:$0xff]  ;;  %v1257_v15 = vld [vmem:[%s3119_s2 + $0x78] sm:$0xff]  ;;  %v1251_v19 = vld [vmem:[%s3119_s2 + $0x48] sm:$0xff] }
 0x1d0   : > { %v951_v18 = vpop.f32.mrf.mxu0  ;;  %v2843_v57 = vadd.f32 %v1794_v43, %v997_v51  ;;  %v1007_v10 = vadd.f32 %v1794_v43, %v994_v3  ;;  %v1812_v22 = vld [vmem:[%s3119_s2 + $0x88] sm:$0xff]  ;;  %v1831_v51 = vld [vmem:[%s3119_s2 + $0x120] sm:$0xff] }
 0x1d1   : > { %v980_v26 = vadd.f32 %v1792_v17, %v967_v23  ;;  %v966_v27 = vadd.f32 %v951_v18, %v818_v20  ;;  %v985_v41 = vmax.f32 %v977_v25, 0.0  ;;  %v999_v40 = vmul.f32 %v1793_v34, %v986_v31  ;;  %v1813_v20 = vld [vmem:[%s3119_s2 + $0x90] sm:$0xff]  ;;  %v1249_v23 = vld [vmem:[%s3119_s2 + $0x38] sm:$0xff]  ;;  %v1246_v25 = vld [vmem:[%s3119_s2 + $0x20] sm:$0xff] }
 0x1d2   : > { %v2849_v6 = vadd.f32 %v1794_v43, %v996_v54  ;;  %v1248_v18 = vld [vmem:[%s3119_s2 + $0x30] sm:$0xff] }
 0x1d3   : > { %v988_v32 = vmax.f32 %v980_v26, 0.0  ;;  %v979_v33 = vadd.f32 %v1792_v17, %v966_v27  ;;  %v998_v48 = vmul.f32 %v1793_v34, %v985_v41  ;;  %v2831_v52 = vadd.f32 %v1794_v43, %v999_v40  ;;  %v1814_v17 = vld [vmem:[%s3119_s2 + $0x98] sm:$0xff]  ;;  %v1244_v27 = vld [vmem:[%s3119_s2 + $0x10] sm:$0xff]  ;;  %v1839_v41 = vld [vmem:[%s3119_s2 + $0x160] sm:$0xff] }
 0x1d4   : > { %v1245_v26 = vld [vmem:[%s3119_s2 + $0x18] sm:$0xff]  ;;  %v1829_v54 = vld [vmem:[%s3119_s2 + $0x110] sm:$0xff] }
 0x1d5   : > { %v1001_v42 = vmul.f32 %v1793_v34, %v988_v32  ;;  %v987_v37 = vmax.f32 %v979_v33, 0.0  ;;  %v2837_v55 = vadd.f32 %v1794_v43, %v998_v48  ;;  %v1841_v33 = vld [vmem:[%s3119_s2 + $0x170] sm:$0xff]  ;;  %v1834_v48 = vld [vmem:[%s3119_s2 + $0x138] sm:$0xff] }
 0x1d7   : > { %v2823_v44 = vadd.f32 %v1794_v43, %v1001_v42  ;;  %v1000_v45 = vmul.f32 %v1793_v34, %v987_v37  ;;  %v1838_v37 = vld [vmem:[%s3119_s2 + $0x158] sm:$0xff] }
 0x1d9   : > { %v2825_v49 = vadd.f32 %v1794_v43, %v1000_v45  ;;  %2140 = vmatprep.subr.mxu1 %v2823_v44  ;;  %2168 = vmatprep.subr.mxu0 %v2823_v44  ;;  %v1837_v43 = vld [vmem:[%s3119_s2 + $0x150] sm:$0xff] }
 0x1da   : > { %2141 = vmatpush3.msra.mxu1 %v2823_v44  ;;  %2169 = vmatpush3.msra.mxu0 %v2823_v44 }
 0x1db   : > { %2142 = vmatprep.subr.mxu1 %v2825_v49  ;;  %2170 = vmatprep.subr.mxu0 %v2825_v49 }
 0x1dc   : > { %2143 = vmatpush3.msra.mxu1 %v2825_v49  ;;  %2171 = vmatpush3.msra.mxu0 %v2825_v49 }
 0x1dd   : > { %2144 = vmatprep.subr.mxu1 %v2831_v52  ;;  %2172 = vmatprep.subr.mxu0 %v2831_v52 }
 0x1de   : > { %2145 = vmatpush3.msra.mxu1 %v2831_v52  ;;  %2173 = vmatpush3.msra.mxu0 %v2831_v52 }
 0x1df   : > { %2146 = vmatprep.subr.mxu1 %v2837_v55  ;;  %2174 = vmatprep.subr.mxu0 %v2837_v55 }
 0x1e0   : > { %2147 = vmatpush3.msra.mxu1 %v2837_v55  ;;  %2175 = vmatpush3.msra.mxu0 %v2837_v55 }
 0x1e1   : > { %2148 = vmatprep.subr.mxu1 %v2843_v57  ;;  %2176 = vmatprep.subr.mxu0 %v2843_v57 }
 0x1e2   : > { %2149 = vmatpush3.msra.mxu1 %v2843_v57  ;;  %2177 = vmatpush3.msra.mxu0 %v2843_v57 }
 0x1e3   : > { %2150 = vmatprep.subr.mxu1 %v2849_v6  ;;  %2178 = vmatprep.subr.mxu0 %v2849_v6 }
 0x1e4   : > { %2151 = vmatpush3.msra.mxu1 %v2849_v6  ;;  %2179 = vmatpush3.msra.mxu0 %v2849_v6 }
 0x1e5   : > { %2152 = vmatprep.subr.mxu1 %v2855_v8  ;;  %2180 = vmatprep.subr.mxu0 %v2855_v8 }
 0x1e6   : > { %2153 = vmatpush3.msra.mxu1 %v2855_v8  ;;  %2181 = vmatpush3.msra.mxu0 %v2855_v8 }
 0x1e7   : > { %2154 = vmatprep.subr.mxu1 %v1007_v10  ;;  %2182 = vmatprep.subr.mxu0 %v1007_v10 }
 0x1e8   : > { %2155 = vmatpush3.msra.mxu1 %v1007_v10  ;;  %2183 = vmatpush3.msra.mxu0 %v1007_v10 }
 0x1e9   : > { %2157 = vmatmul.mubr.msk.f32.vlgmr.msra.gmra.mxu1 %vm299_vm0, %v2626_v58  ;;  %2185 = vmatmul.mubr.msk.f32.vlgmr.msra.gmra.mxu0 %vm299_vm0, %v2728_v9  ;;  %v1824_v58 = vld [vmem:[%s3119_s2 + $0xe8] sm:$0xff]  ;;  %v1823_v9 = vld [vmem:[%s3119_s2 + $0xe0] sm:$0xff] }
 0x1ea   : > { %2240 = vmatprep.subr.mxu0 %v1826_v12  ;;  %2159 = vmatprep.mubr.msk.f32.mxu1 %vm299_vm0, %v2633_v59  ;;  %v1822_v59 = vld [vmem:[%s3119_s2 + $0xd8] sm:$0xff] }
 0x1eb   : > { %2241 = vmatpush3.msra.mxu0 %v1826_v12  ;;  %2187 = vmatprep.mubr.msk.f32.mxu0 %vm299_vm0, %v2737_v11  ;;  %v1253_v11 = vld [vmem:[%s3119_s2 + $0x58] sm:$0xff] }
 0x1ec   : > { %2242 = vmatprep.subr.mxu0 %v1825_v14  ;;  %2196 = vmatprep.subr.mxu1 %v1257_v15 }
 0x1ed   : > { %2243 = vmatpush3.msra.mxu0 %v1825_v14  ;;  %2160 = vmatmul.mubr.msk.f32.gmra.mxu1 %vm299_vm0, %v2657_v62  ;;  %v1821_v62 = vld [vmem:[%s3119_s2 + $0xd0] sm:$0xff] }
 0x1ee   : > { %2188 = vmatmul.mubr.msk.f32.gmra.mxu0 %vm299_vm0, %v2750_v13  ;;  %2244 = vmatprep.subr.mxu0 %v1824_v58  ;;  %v1815_v13 = vld [vmem:[%s3119_s2 + $0xa0] sm:$0xff] }
 0x1ef   : > { %2245 = vmatpush3.msra.mxu0 %v1824_v58  ;;  %2162 = vmatprep.mubr.msk.f32.mxu1 %vm299_vm0, %v2663_v63  ;;  %v1256_v63 = vld [vmem:[%s3119_s2 + $0x70] sm:$0xff] }
 0x1f0   : > { %2246 = vmatprep.subr.mxu0 %v1823_v9  ;;  %2190 = vmatprep.mubr.msk.f32.mxu0 %vm299_vm0, %v2539_v1  ;;  %v1820_v1 = vld [vmem:[%s3119_s2 + $0xc8] sm:$0xff] }
 0x1f1   : > { %2247 = vmatpush3.msra.mxu0 %v1823_v9  ;;  %2163 = vmatmul.mubr.msk.f32.gmra.mxu1 %vm299_vm0, %v2687_v4  ;;  %v1255_v4 = vld [vmem:[%s3119_s2 + $0x68] sm:$0xff] }
 0x1f2   : > { %2191 = vmatmul.mubr.msk.f32.gmra.mxu0 %vm299_vm0, %v2641_v60  ;;  %2248 = vmatprep.subr.mxu0 %v1822_v59  ;;  %v1819_v60 = vld [vmem:[%s3119_s2 + $0xc0] sm:$0xff] }
 0x1f3   : > { %2249 = vmatpush3.msra.mxu0 %v1822_v59  ;;  %2165 = vmatprep.mubr.msk.f32.mxu1 %vm299_vm0, %v2693_v5  ;;  %v1254_v5 = vld [vmem:[%s3119_s2 + $0x60] sm:$0xff] }
 0x1f4   : > { %2250 = vmatprep.subr.mxu0 %v1821_v62  ;;  %2193 = vmatprep.mubr.msk.f32.mxu0 %vm299_vm0, %v2649_v61  ;;  %v1818_v61 = vld [vmem:[%s3119_s2 + $0xb8] sm:$0xff] }
 0x1f5   : > { %2251 = vmatpush3.msra.mxu0 %v1821_v62  ;;  %2166 = vmatmul.mubr.msk.f32.gmra.mxu1 %vm299_vm0, %v2710_v7  ;;  %v1816_v7 = vld [vmem:[%s3119_s2 + $0xa8] sm:$0xff] }
 0x1f6   : > { %2194 = vmatmul.mubr.msk.f32.gmra.mxu0 %vm299_vm0, %v2673_v2  ;;  %2252 = vmatprep.subr.mxu0 %v1820_v1  ;;  %v1817_v2 = vld [vmem:[%s3119_s2 + $0xb0] sm:$0xff] }
 0x1f7   : > { %2253 = vmatpush3.msra.mxu0 %v1820_v1  ;;  %2272 = vmatprep.mubr.f32.mxu0 %v1007_v10 }
 0x1f8   : > { %2254 = vmatprep.subr.mxu0 %v1819_v60  ;;  %2197 = vmatpush3.msra.mxu1 %v1257_v15 }
 0x1f9   : > { %2255 = vmatpush3.msra.mxu0 %v1819_v60  ;;  %2198 = vmatprep.subr.mxu1 %v1256_v63 }
 0x1fa   : > { %2256 = vmatprep.subr.mxu0 %v1818_v61  ;;  %2199 = vmatpush3.msra.mxu1 %v1256_v63 }
 0x1fb   : > { %2257 = vmatpush3.msra.mxu0 %v1818_v61  ;;  %2200 = vmatprep.subr.mxu1 %v1255_v4 }
 0x1fc   : > { %2258 = vmatprep.subr.mxu0 %v1817_v2  ;;  %2201 = vmatpush3.msra.mxu1 %v1255_v4 }
 0x1fd   : > { %2259 = vmatpush3.msra.mxu0 %v1817_v2  ;;  %2202 = vmatprep.subr.mxu1 %v1254_v5 }
 0x1fe   : > { %2260 = vmatprep.subr.mxu0 %v1816_v7  ;;  %2203 = vmatpush3.msra.mxu1 %v1254_v5 }
 0x1ff   : > { %2261 = vmatpush3.msra.mxu0 %v1816_v7  ;;  %2204 = vmatprep.subr.mxu1 %v1253_v11 }
 0x200   : > { %2262 = vmatprep.subr.mxu0 %v1815_v13  ;;  %2205 = vmatpush3.msra.mxu1 %v1253_v11  ;;  %v1843_v11 = vld [vmem:[%s3121_s4 + $0x3] ss:$0 sm:$0xff] }
 0x201   : > { %2263 = vmatpush3.msra.mxu0 %v1815_v13  ;;  %2206 = vmatprep.subr.mxu1 %v1252_v16 }
 0x202   : > { %2264 = vmatprep.subr.mxu0 %v1814_v17  ;;  %2207 = vmatpush3.msra.mxu1 %v1252_v16 }
 0x203   : > { %2265 = vmatpush3.msra.mxu0 %v1814_v17  ;;  %2208 = vmatprep.subr.mxu1 %v1251_v19 }
 0x204   : > { %2266 = vmatprep.subr.mxu0 %v1813_v20  ;;  %2209 = vmatpush3.msra.mxu1 %v1251_v19 }
 0x205   : > { %2267 = vmatpush3.msra.mxu0 %v1813_v20  ;;  %2210 = vmatprep.subr.mxu1 %v1250_v21 }
 0x206   : > { %2268 = vmatprep.subr.mxu0 %v1812_v22  ;;  %2211 = vmatpush3.msra.mxu1 %v1250_v21 }
 0x207   : > { %2269 = vmatpush3.msra.mxu0 %v1812_v22  ;;  %2212 = vmatprep.subr.mxu1 %v1249_v23 }
 0x208   : > { %2270 = vmatprep.subr.mxu0 %v1811_v24  ;;  %2213 = vmatpush3.msra.mxu1 %v1249_v23  ;;  %v1844_v23 = vld [vmem:[%s3121_s4 + $0x4] ss:$0 sm:$0xff] }
 0x209   : > { %2271 = vmatpush3.msra.mxu0 %v1811_v24  ;;  %2214 = vmatprep.subr.mxu1 %v1248_v18 }
 0x20a   : > { %2273 = vmatmul.mubr.f32.vlgmr.msra.gmra.mxu0 %v2855_v8  ;;  %2215 = vmatpush3.msra.mxu1 %v1248_v18 }
 0x20b   : > { %2275 = vmatprep.mubr.f32.mxu0 %v2849_v6  ;;  %2216 = vmatprep.subr.mxu1 %v1247_v0 }
 0x20c   : > { %2217 = vmatpush3.msra.mxu1 %v1247_v0 }
 0x20d   : > { %2218 = vmatprep.subr.mxu1 %v1246_v25 }
 0x20e   : > { %2276 = vmatmul.mubr.f32.gmra.mxu0 %v2843_v57  ;;  %2219 = vmatpush3.msra.mxu1 %v1246_v25  ;;  %v1827_v57 = vld [vmem:[%s3119_s2 + $0x100] sm:$0xff] }
 0x20f   : > { %2278 = vmatprep.mubr.f32.mxu0 %v2837_v55  ;;  %2220 = vmatprep.subr.mxu1 %v1245_v26 }
 0x210   : > { %2221 = vmatpush3.msra.mxu1 %v1245_v26 }
 0x211   : > { %2222 = vmatprep.subr.mxu1 %v1244_v27 }
 0x212   : > { %2279 = vmatmul.mubr.f32.gmra.mxu0 %v2831_v52  ;;  %2223 = vmatpush3.msra.mxu1 %v1244_v27  ;;  %v1845_v27 = vld [vmem:[%s3121_s4 + $0x5] ss:$0 sm:$0xff] }
 0x213   : > { %2281 = vmatprep.mubr.f32.mxu0 %v2825_v49  ;;  %2224 = vmatprep.subr.mxu1 %v1243_v28  ;;  %v1833_v49 = vld [vmem:[%s3119_s2 + $0x130] sm:$0xff] }
 0x214   : > { %2225 = vmatpush3.msra.mxu1 %v1243_v28 }
 0x215   : > { %2226 = vmatprep.subr.mxu1 %v1242_v29 }
 0x216   : > { %2282 = vmatmul.mubr.f32.gmra.mxu0 %v2823_v44  ;;  %2227 = vmatpush3.msra.mxu1 %v1242_v29  ;;  %v1836_v44 = vld [vmem:[%s3119_s2 + $0x148] sm:$0xff] }
 0x217   : > { %2284 = vmatprep.subr.mxu1 %v1842_v30 }
 0x2a9   : > { %v2158_v31 = vpop.f32.mrf.mxu1  ;;  %v2186_v40 = vpop.f32.mrf.mxu0 }
 0x2ab   : > { %v1081_v32 = vpop.f32.mrf.mxu1  ;;  %v1186_v47 = vpop.f32.mrf.mxu0 }
 0x2ac   : > { %2228 = vmatprep.mubr.f32.mxu1 %v1081_v32 }
 0x2ad   : > { %v2161_v34 = vpop.f32.mrf.mxu1  ;;  %2229 = vmatmul.mubr.f32.vlgmr.msra.gmra.mxu1 %v2158_v31 }
 0x2ae   : > { %2285 = vmatpush3.msra.mxu1 %v1842_v30  ;;  %v2189_v52 = vpop.f32.mrf.mxu0 }
 0x2af   : > { %2286 = vmatprep.subr.mxu1 %v1841_v33  ;;  %v1091_v36 = vpop.f32.mrf.mxu1 }
 0x2b0   : > { %2287 = vmatpush3.msra.mxu1 %v1841_v33  ;;  %2231 = vmatprep.mubr.f32.mxu1 %v1091_v36  ;;  %v1196_v55 = vpop.f32.mrf.mxu0 }
 0x2b1   : > { %2288 = vmatprep.subr.mxu1 %v1840_v35  ;;  %v2164_v42 = vpop.f32.mrf.mxu1  ;;  %2232 = vmatmul.mubr.f32.gmra.mxu1 %v2161_v34 }
 0x2b2   : > { %2289 = vmatpush3.msra.mxu1 %v1840_v35  ;;  %v2192_v3 = vpop.f32.mrf.mxu0 }
 0x2b3   : > { %2290 = vmatprep.subr.mxu1 %v1839_v41  ;;  %v1101_v38 = vpop.f32.mrf.mxu1 }
 0x2b4   : > { %2291 = vmatpush3.msra.mxu1 %v1839_v41  ;;  %2234 = vmatprep.mubr.f32.mxu1 %v1101_v38  ;;  %v1206_v6 = vpop.f32.mrf.mxu0 }
 0x2b5   : > { %2292 = vmatprep.subr.mxu1 %v1838_v37  ;;  %v2167_v39 = vpop.f32.mrf.mxu1  ;;  %2235 = vmatmul.mubr.f32.gmra.mxu1 %v2164_v42 }
 0x2b6   : > { %2293 = vmatpush3.msra.mxu1 %v1838_v37  ;;  %v2195_v8 = vpop.f32.mrf.mxu0 }
 0x2b7   : > { %2294 = vmatprep.subr.mxu1 %v1837_v43  ;;  %v1111_v45 = vpop.f32.mrf.mxu1 }
 0x2b8   : > { %2295 = vmatpush3.msra.mxu1 %v1837_v43  ;;  %2237 = vmatprep.mubr.f32.mxu1 %v1111_v45  ;;  %v1216_v10 = vpop.f32.mrf.mxu0 }
 0x2b9   : > { %2296 = vmatprep.subr.mxu1 %v1836_v44  ;;  %2238 = vmatmul.mubr.f32.gmra.mxu1 %v2167_v39 }
 0x2ba   : > { %2297 = vmatpush3.msra.mxu1 %v1836_v44  ;;  %2316 = vmatprep.mubr.f32.mxu1 %v1186_v47 }
 0x2bb   : > { %2298 = vmatprep.subr.mxu1 %v1835_v46 }
 0x2bc   : > { %2299 = vmatpush3.msra.mxu1 %v1835_v46 }
 0x2bd   : > { %2300 = vmatprep.subr.mxu1 %v1834_v48 }
 0x2be   : > { %2301 = vmatpush3.msra.mxu1 %v1834_v48 }
 0x2bf   : > { %2302 = vmatprep.subr.mxu1 %v1833_v49 }
 0x2c0   : > { %2303 = vmatpush3.msra.mxu1 %v1833_v49 }
 0x2c1   : > { %2304 = vmatprep.subr.mxu1 %v1832_v50 }
 0x2c2   : > { %2305 = vmatpush3.msra.mxu1 %v1832_v50 }
 0x2c3   : > { %2306 = vmatprep.subr.mxu1 %v1831_v51 }
 0x2c4   : > { %2307 = vmatpush3.msra.mxu1 %v1831_v51 }
 0x2c5   : > { %2308 = vmatprep.subr.mxu1 %v1830_v53 }
 0x2c6   : > { %2309 = vmatpush3.msra.mxu1 %v1830_v53 }
 0x2c7   : > { %2310 = vmatprep.subr.mxu1 %v1829_v54 }
 0x2c8   : > { %2311 = vmatpush3.msra.mxu1 %v1829_v54 }
 0x2c9   : > { %2312 = vmatprep.subr.mxu1 %v1828_v56 }
 0x2ca   : > { %2313 = vmatpush3.msra.mxu1 %v1828_v56  ;;  %v2274_v9 = vpop.f32.mrf.mxu0 }
 0x2cb   : > { %2314 = vmatprep.subr.mxu1 %v1827_v57 }
 0x2cc   : > { %2315 = vmatpush3.msra.mxu1 %v1827_v57  ;;  %v1429_v62 = vpop.f32.mrf.mxu0 }
 0x2cd   : > { %2317 = vmatmul.mubr.f32.vlgmr.msra.gmra.mxu1 %v2186_v40 }
 0x2ce   : > { %2319 = vmatprep.mubr.f32.mxu1 %v1196_v55  ;;  %v2277_v60 = vpop.f32.mrf.mxu0 }
 0x2d0   : > { %v1439_v61 = vpop.f32.mrf.mxu0 }
 0x2d1   : > { %2320 = vmatmul.mubr.f32.gmra.mxu1 %v2189_v52 }
 0x2d2   : > { %2322 = vmatprep.mubr.f32.mxu1 %v1206_v6  ;;  %v2280_v2 = vpop.f32.mrf.mxu0 }
 0x2d4   : > { %v1449_v19 = vpop.f32.mrf.mxu0 }
 0x2d5   : > { %2323 = vmatmul.mubr.f32.gmra.mxu1 %v2192_v3 }
 0x2d6   : > { %2325 = vmatprep.mubr.f32.mxu1 %v1216_v10  ;;  %v2283_v29 = vpop.f32.mrf.mxu0 }
 0x2d8   : > { %v1459_v44 = vpop.f32.mrf.mxu0 }
 0x2d9   : > { %2326 = vmatmul.mubr.f32.gmra.mxu1 %v2195_v8 }
 0x36d   : > { %v2230_v12 = vpop.f32.mrf.mxu1 }
 0x36e   : > { %v1435_v5 = vadd.f32 %v2274_v9, %v2230_v12 }
 0x36f   : > { %v1324_v14 = vpop.f32.mrf.mxu1 }
 0x370   : > { %v1430_v13 = vadd.f32 %v1429_v62, %v1324_v14 }
 0x371   : > { %v2233_v15 = vpop.f32.mrf.mxu1 }
 0x372   : > { %v1445_v20 = vadd.f32 %v2277_v60, %v2233_v15 }
 0x373   : > { %v1334_v58 = vpop.f32.mrf.mxu1 }
 0x374   : > { %v1440_v18 = vadd.f32 %v1439_v61, %v1334_v58 }
 0x375   : > { %v2236_v59 = vpop.f32.mrf.mxu1 }
 0x376   : > { %v1455_v34 = vadd.f32 %v2280_v2, %v2236_v59 }
 0x377   : > { %v1344_v1 = vpop.f32.mrf.mxu1 }
 0x378   : > { %v1450_v35 = vadd.f32 %v1449_v19, %v1344_v1 }
 0x379   : > { %v2239_v63 = vpop.f32.mrf.mxu1 }
 0x37a   : > { %v1465_v43 = vadd.f32 %v2283_v29, %v2239_v63 }
 0x37b   : > { %v1354_v4 = vpop.f32.mrf.mxu1 }
 0x37c   : > { %v1460_v49 = vadd.f32 %v1459_v44, %v1354_v4 }
 0x38d   : > { %v2318_v7 = vpop.f32.mrf.mxu1 }
 0x38e   : > { %v1591_v16 = vadd.f32 %v2318_v7, %v1435_v5 }
 0x38f   : > { %v1551_v17 = vpop.f32.mrf.mxu1 }
 0x390   : > { %v1604_v21 = vadd.f32 %v1843_v11, %v1591_v16  ;;  %v1590_v22 = vadd.f32 %v1551_v17, %v1430_v13 }
 0x391   : > { %v2321_v24 = vpop.f32.mrf.mxu1 }
 0x392   : > { %v1612_v0 = vmax.f32 %v1604_v21, 0.0  ;;  %v1603_v25 = vadd.f32 %v1843_v11, %v1590_v22  ;;  %v1593_v26 = vadd.f32 %v2321_v24, %v1445_v20 }
 0x393   : > { %v1561_v28 = vpop.f32.mrf.mxu1 }
 0x394   : > { %v1625_v30 = vmul.f32 %v1844_v23, %v1612_v0  ;;  %v1611_v31 = vmax.f32 %v1603_v25, 0.0  ;;  %v1606_v32 = vadd.f32 %v1843_v11, %v1593_v26  ;;  %v1592_v33 = vadd.f32 %v1561_v28, %v1440_v18 }
 0x395   : > { %v2324_v36 = vpop.f32.mrf.mxu1 }
 0x396   : > { %v1638_v41 = vadd.f32 %v1845_v27, %v1625_v30  ;;  %v1624_v42 = vmul.f32 %v1844_v23, %v1611_v31  ;;  %v1614_v37 = vmax.f32 %v1606_v32, 0.0  ;;  %v1605_v38 = vadd.f32 %v1843_v11, %v1592_v33 }
 0x397   : > { %v1595_v39 = vadd.f32 %v2324_v36, %v1455_v34  ;;  %v1571_v40 = vpop.f32.mrf.mxu1 }
 0x398   : > { %1646 = vst [vmem:[%s3056_s16 + $0x8] sm:$0xff] %v1638_v41  ;;  %v1637_v45 = vadd.f32 %v1845_v27, %v1624_v42  ;;  %v1627_v46 = vmul.f32 %v1844_v23, %v1614_v37  ;;  %v1613_v47 = vmax.f32 %v1605_v38, 0.0  ;;  %v1594_v48 = vadd.f32 %v1571_v40, %v1450_v35 }
 0x399   : > { %v1608_v50 = vadd.f32 %v1843_v11, %v1595_v39  ;;  %v2327_v51 = vpop.f32.mrf.mxu1 }
 0x39a   : > { %1645 = vst [vmem:[%s3056_s16] sm:$0xff] %v1637_v45  ;;  %v1640_v52 = vadd.f32 %v1845_v27, %v1627_v46  ;;  %v1626_v53 = vmul.f32 %v1844_v23, %v1613_v47  ;;  %v1607_v54 = vadd.f32 %v1843_v11, %v1594_v48  ;;  %v1597_v55 = vadd.f32 %v2327_v51, %v1465_v43 }
 0x39b   : > { %v1616_v56 = vmax.f32 %v1608_v50, 0.0  ;;  %v1581_v57 = vpop.f32.mrf.mxu1 }
 0x39c   : > { %1648 = vst [vmem:[%s3056_s16 + $0x18] sm:$0xff] %v1640_v52  ;;  %v1639_v3 = vadd.f32 %v1845_v27, %v1626_v53  ;;  %v1615_v6 = vmax.f32 %v1607_v54, 0.0  ;;  %v1610_v8 = vadd.f32 %v1843_v11, %v1597_v55  ;;  %v1596_v10 = vadd.f32 %v1581_v57, %v1460_v49 }
 0x39d   : > { %v1629_v12 = vmul.f32 %v1844_v23, %v1616_v56 }
 0x39e   : > { %1647 = vst [vmem:[%s3056_s16 + $0x10] sm:$0xff] %v1639_v3  ;;  %v1628_v14 = vmul.f32 %v1844_v23, %v1615_v6  ;;  %v1618_v15 = vmax.f32 %v1610_v8, 0.0  ;;  %v1609_v58 = vadd.f32 %v1843_v11, %v1596_v10 }
 0x39f   : > { %v1642_v9 = vadd.f32 %v1845_v27, %v1629_v12 }
 0x3a0   : > { %v1641_v59 = vadd.f32 %v1845_v27, %v1628_v14  ;;  %v1631_v62 = vmul.f32 %v1844_v23, %v1618_v15  ;;  %v1617_v1 = vmax.f32 %v1609_v58, 0.0 }
 0x3a1   : > { %1650 = vst [vmem:[%s3056_s16 + $0x28] sm:$0xff] %v1642_v9 }
 0x3a2   : > { %1649 = vst [vmem:[%s3056_s16 + $0x20] sm:$0xff] %v1641_v59  ;;  %v1644_v60 = vadd.f32 %v1845_v27, %v1631_v62  ;;  %v1630_v63 = vmul.f32 %v1844_v23, %v1617_v1 }
 0x3a4   : > { %1652 = vst [vmem:[%s3056_s16 + $0x38] sm:$0xff] %v1644_v60  ;;  %v1643_v61 = vadd.f32 %v1845_v27, %v1630_v63 }
 0x3a6   : > { %1651 = vst [vmem:[%s3056_s16 + $0x30] sm:$0xff] %v1643_v61 }
 0x3a7   : > { %2398 = shalt.err (!%p2395_p3)
}
 0x3a8   : > { %s2399_s10 = scalar_lea.hbm %s3069_s30, 1024  ;;  %s2403_s13 = scalar_lea.hbm %s3122_s5, 2048 }
 0x3a9   : > { %p2400_p4 = scmp.ne.s32.totalorder %s3069_s30, %s2399_s10  ;;  %p2404_p9 = scmp.lt.s32.totalorder %s3069_s30, %s3122_s5 }
 0x3aa   : > { %p2405_p10 = scmp.lt.s32.totalorder %s2403_s13, %s2399_s10 }
 0x3ab   : > { %p2401_p7 = pnand %p2400_p4, %p2518_p5 }
 0x3ac   : > { %p2406_p11 = por %p2405_p10, %p2404_p9 }
 0x3ad   : > { %p2402_p8 = pneg %p2401_p7 }
 0x3af   : > { %p2407_p12 = pnand %p2406_p11, %p2402_p8 }
 0x3b1   : > { %2410 = shalt.err (!%p2407_p12)
}
 0x3b2   : > { %s2448_s16 = smov 128   ;;  %s2449_s17 = smov 8  }
 0x3b3   : > { %2344 = dma.vmem_to_hbm [thread:$0]  (%p2518_p5), %s3071_s23, 1024, %s3069_s30, %s3077_s22, %s2448_s16, %s2448_s16, %s2449_s17  }
 0x3b4 PF: > { %p2350_p13 = scmp.ge.s32.totalorder %s2445_s21, 2  ;;  %s1682_s25 = sand.u32 1, %s2433_s18  }
 0x3b5   : > { %s1683_s26 = scalar_lea.sflag [#allocation3], %s1682_s25 }
 0x3b6   : > { %p2347_p0 = pnand %p2350_p13, %p2522_p6 }
 0x3b8   : > { %p2348_p1 = pneg %p2347_p0 }
 0x3ba   : > { %2428 = dma.done.wait (%p2348_p1), %s1683_s26, 1024  }
 0x3bb   : > { %2430 = vsyncadd (%p2348_p1), %s1683_s26, 4294966272  ;;  %p15_p2 = scmp.ge.s32.totalorder %s2505_s24, 4   ;;  %s3125_s18 = smov %s2437_s19 }
 0x3bc   : > { %s3126_s19 = smov %s2441_s20  ;;  %s3127_s20 = smov %s2516_s27 }
 0x3bd   : > { %s3128_s21 = smov %s2505_s24  ;;  %17 = sbr.rel (!%p15_p2) target bundleno = 3 (0x3), region = 80 }
 0x3c2   :  { %1688 = vsyncpa [#allocation3], 1 }
 0x3c3   :  { %1690 = vsyncpa [#allocation3 + $0x1], 1 }

</bundles_post_ra>
